<compile_context>
chip_gen: v7x
topology: tpu7x:2x2x1
jax: 0.10.0
libtpu: 0.0.40
codegen_flags: <defaults>
</compile_context>

<pallas_src>
import functools
import math

import jax
import jax.numpy as jnp
from jax import lax
from jax.experimental import pallas as pl
from jax.experimental.pallas import tpu as pltpu


# --------------------------------------------------------------------------- #
# Hardware-aware helpers
# --------------------------------------------------------------------------- #
@functools.lru_cache(maxsize=None)
def _vmem_limit_bytes():
    """Explicit scoped-VMEM limit: v5e defaults to only 16 MiB of its 128 MiB,
    v7x only has 64 MiB physical.  3/4 of capacity, capped at 100 MiB."""
    try:
        cap = int(pltpu.get_tpu_info().vmem_capacity_bytes)
    except Exception:
        cap = 64 * 1024 * 1024          # conservative fallback (v7x-sized)
    return int(min(cap * 3 // 4, 100 * 1024 * 1024))


def _sublane_align(dtype):
    """Sublane divisibility for the second-to-last block dim: 8 for 4-byte,
    16 for 2-byte, 32 for 1-byte dtypes."""
    return max(8, 32 // jnp.dtype(dtype).itemsize)


def _pick_tile(dim, pref, align):
    """Largest tile <= pref that divides `dim` and respects `align`, else dim
    (a full-dimension block is always legal)."""
    if dim <= pref:
        return dim
    t = (pref // align) * align
    while t >= align:
        if dim % t == 0:
            return t
        t -= align
    return dim


def _split_for_megacore(dim, tile, align):
    """If a tile covers the whole dim, try splitting it in two so the parallel
    grid axis has >= 2 iterations (keeps v7x's 2nd TensorCore busy)."""
    if dim // tile >= 2 or dim < 2 * align:
        return tile
    t = _pick_tile(dim, max(align, tile // 2), align)
    return t if dim // t >= 2 else tile


# --------------------------------------------------------------------------- #
# Tiled linear:  y = x @ w + b      (w may be pre-cast to bf16, bias stays f32)
# --------------------------------------------------------------------------- #
def _linear_kernel(x_ref, w_ref, b_ref, o_ref, acc_ref):
    @pl.when(pl.program_id(2) == 0)
    def _init():
        acc_ref[...] = jnp.zeros(acc_ref.shape, jnp.float32)

    # Cast the activation tile to the (possibly bf16) weight dtype so the MXU
    # runs at its native rate; accumulate in f32.
    acc_ref[...] += jnp.dot(x_ref[...].astype(w_ref.dtype), w_ref[...],
                            preferred_element_type=jnp.float32)

    @pl.when(pl.program_id(2) == pl.num_programs(2) - 1)
    def _finalize():
        o_ref[...] = (acc_ref[...] + b_ref[...]).astype(o_ref.dtype)


def linear(x, w, b, *, tm=512, tn=512, tk=512):
    """Tiled, pipelined matmul + bias.  x:(M,K), w:(K,N), b:(N,) -> (M,N)."""
    M, K = x.shape
    K2, N = w.shape
    assert K == K2 and b.shape == (N,)

    am = _sublane_align(x.dtype)
    tm = _pick_tile(M, tm, am)
    tn = _pick_tile(N, tn, 128)
    tk = _pick_tile(K, tk, 128)
    if (M // tm) * (N // tn) < 2:           # give v7x's 2nd core something to do
        tm = _split_for_megacore(M, tm, am)

    grid = (M // tm, N // tn, K // tk)      # reduction axis last
    cost = pl.CostEstimate(
        flops=2 * M * N * K,
        transcendentals=0,
        bytes_accessed=int(M * K * x.dtype.itemsize + K * N * w.dtype.itemsize
                           + 4 * N + M * N * x.dtype.itemsize))
    return pl.pallas_call(
        _linear_kernel,
        out_shape=jax.ShapeDtypeStruct((M, N), x.dtype),
        grid=grid,
        in_specs=[
            pl.BlockSpec((tm, tk), lambda i, j, k: (i, k)),
            pl.BlockSpec((tk, tn), lambda i, j, k: (k, j)),
            pl.BlockSpec((1, tn), lambda i, j, k: (0, j)),
        ],
        out_specs=pl.BlockSpec((tm, tn), lambda i, j, k: (i, j)),
        scratch_shapes=[pltpu.VMEM((tm, tn), jnp.float32)],
        compiler_params=pltpu.CompilerParams(
            dimension_semantics=("parallel", "parallel", "arbitrary"),
            vmem_limit_bytes=_vmem_limit_bytes()),
        cost_estimate=cost,
    )(x, w, b.reshape(1, N))


# --------------------------------------------------------------------------- #
# Single-head flash attention kernel (online softmax), shared by both layouts.
# The softmax scale is already folded into the Q projection weights.
# --------------------------------------------------------------------------- #
def _flash_kernel(q_ref, k_ref, v_ref, o_ref, q_sc, m_sc, l_sc, acc_sc, *,
                  kv_axis, mxu_dtype):
    ki = pl.program_id(kv_axis)

    @pl.when(ki == 0)
    def _init():
        # Stage the kv-invariant Q tile once per q tile, pre-cast to the MXU
        # operand dtype -> zero per-kv-step work on Q.
        q_sc[...] = q_ref[0].astype(mxu_dtype)
        m_sc[...] = jnp.full(m_sc.shape, -jnp.inf, jnp.float32)
        l_sc[...] = jnp.zeros(l_sc.shape, jnp.float32)
        acc_sc[...] = jnp.zeros(acc_sc.shape, jnp.float32)

    k = k_ref[0].astype(mxu_dtype)                               # (tk, dh)
    # q @ k^T via dot_general dimension numbers (no explicit transpose).
    s = lax.dot_general(q_sc[...], k, (((1,), (1,)), ((), ())),
                        preferred_element_type=jnp.float32)      # (tq, tk)

    m_prev = m_sc[...]                                           # (tq, 1)
    m_new = jnp.maximum(m_prev, jnp.max(s, axis=-1, keepdims=True))
    alpha = jnp.exp(m_prev - m_new)
    p = jnp.exp(s - m_new)                                       # (tq, tk) f32

    l_sc[...] = alpha * l_sc[...] + jnp.sum(p, axis=-1, keepdims=True)
    pv = jnp.dot(p.astype(mxu_dtype), v_ref[0].astype(mxu_dtype),
                 preferred_element_type=jnp.float32)             # (tq, dh)
    acc_sc[...] = alpha * acc_sc[...] + pv
    m_sc[...] = m_new

    @pl.when(ki == pl.num_programs(kv_axis) - 1)
    def _finalize():
        inv_l = pl.reciprocal(l_sc[...], approx=True)            # EUP slot, ~free
        o_ref[0] = (acc_sc[...] * inv_l).astype(o_ref.dtype)


def _flash_scratch(tq, d_head, mxu_dtype):
    return [
        pltpu.VMEM((tq, d_head), mxu_dtype),    # staged (pre-cast) Q tile
        pltpu.VMEM((tq, 1), jnp.float32),       # running max m
        pltpu.VMEM((tq, 1), jnp.float32),       # running denom l
        pltpu.VMEM((tq, d_head), jnp.float32),  # running numerator
    ]


def flash_attention_heads_in_grid(q, k, v, *, n_head, d_head, mxu_dtype,
                                  q_off=0, k_off=0, v_off=0, tq=256, tk=512):
    """Head-in-grid flash attention (requires d_head % 128 == 0).

    q/k/v are (B, L, C) arrays whose last dim is a concatenation of d_head-wide
    column blocks (C = d_model, or 3*d_model for a fused QKV activation);
    *_off select the first column block (in d_head units) of the Q/K/V section.
    Returns (B, Lq, n_head * d_head)."""
    B, Lq, _ = q.shape
    Lk = k.shape[1]
    d_model = n_head * d_head

    sa = _sublane_align(q.dtype)
    tq = _pick_tile(Lq, tq, sa)
    tk = _pick_tile(Lk, tk, sa)
    grid = (B, n_head, Lq // tq, Lk // tk)          # kv (reduction) axis last

    kernel = functools.partial(_flash_kernel, kv_axis=3, mxu_dtype=mxu_dtype)
    cost = pl.CostEstimate(
        flops=4 * B * n_head * Lq * Lk * d_head,
        transcendentals=B * n_head * Lq * Lk,
        bytes_accessed=int((2 * B * Lq * d_model + 2 * B * Lk * d_model)
                           * q.dtype.itemsize))
    return pl.pallas_call(
        kernel,
        out_shape=jax.ShapeDtypeStruct((B, Lq, d_model), q.dtype),
        grid=grid,
        in_specs=[
            pl.BlockSpec((1, tq, d_head), lambda b, h, qi, ki: (b, qi, q_off + h)),
            pl.BlockSpec((1, tk, d_head), lambda b, h, qi, ki: (b, ki, k_off + h)),
            pl.BlockSpec((1, tk, d_head), lambda b, h, qi, ki: (b, ki, v_off + h)),
        ],
        out_specs=pl.BlockSpec((1, tq, d_head), lambda b, h, qi, ki: (b, qi, h)),
        scratch_shapes=_flash_scratch(tq, d_head, mxu_dtype),
        compiler_params=pltpu.CompilerParams(
            dimension_semantics=("parallel", "parallel", "parallel", "arbitrary"),
            vmem_limit_bytes=_vmem_limit_bytes()),
        cost_estimate=cost,
    )(q, k, v)


def flash_attention_batched_heads(q, k, v, *, mxu_dtype, tq=256, tk=512):
    """Fallback for d_head % 128 != 0: heads folded into the batch axis.
    q: (B*H, Lq, d_head), k/v: (B*H, Lk, d_head) -> (B*H, Lq, d_head)."""
    BH, Lq, dh = q.shape
    Lk = k.shape[1]

    sa = _sublane_align(q.dtype)
    tq = _pick_tile(Lq, tq, sa)
    tk = _pick_tile(Lk, tk, sa)
    grid = (BH, Lq // tq, Lk // tk)                 # kv (reduction) axis last

    kernel = functools.partial(_flash_kernel, kv_axis=2, mxu_dtype=mxu_dtype)
    cost = pl.CostEstimate(
        flops=4 * BH * Lq * Lk * dh,
        transcendentals=BH * Lq * Lk,
        bytes_accessed=int((2 * BH * Lq * dh + 2 * BH * Lk * dh)
                           * q.dtype.itemsize))
    return pl.pallas_call(
        kernel,
        out_shape=jax.ShapeDtypeStruct((BH, Lq, dh), q.dtype),
        grid=grid,
        in_specs=[
            pl.BlockSpec((1, tq, dh), lambda b, qi, ki: (b, qi, 0)),
            pl.BlockSpec((1, tk, dh), lambda b, qi, ki: (b, ki, 0)),
            pl.BlockSpec((1, tk, dh), lambda b, qi, ki: (b, ki, 0)),
        ],
        out_specs=pl.BlockSpec((1, tq, dh), lambda b, qi, ki: (b, qi, 0)),
        scratch_shapes=_flash_scratch(tq, dh, mxu_dtype),
        compiler_params=pltpu.CompilerParams(
            dimension_semantics=("parallel", "parallel", "arbitrary"),
            vmem_limit_bytes=_vmem_limit_bytes()),
        cost_estimate=cost,
    )(q, k, v)


# --------------------------------------------------------------------------- #
# Head split/merge (only used on the small-d_head fallback path)
# --------------------------------------------------------------------------- #
def _split_heads(x, n_head):        # (B, L, D) -> (B*H, L, d_head)
    B, L, D = x.shape
    dh = D // n_head
    return x.reshape(B, L, n_head, dh).transpose(0, 2, 1, 3).reshape(B * n_head, L, dh)


def _merge_heads(x, B, n_head):     # (B*H, L, d_head) -> (B, L, D)
    BH, L, dh = x.shape
    return x.reshape(B, n_head, L, dh).transpose(0, 2, 1, 3).reshape(B, L, n_head * dh)


def _attention_small_head(Q, K, V, B, n_head, mxu_dtype):
    """d_head % 128 != 0 fallback: fold heads into the batch axis so kernel
    blocks stay lane-dense over the full d_head (mirrors the module's
    tensor_split / tensor_concat)."""
    # TODO(synk): for large models with d_head % 128 != 0, these host-side
    # split/merge transposes cost one extra HBM round trip of the activations.
    ctx = flash_attention_batched_heads(
        _split_heads(Q, n_head), _split_heads(K, n_head), _split_heads(V, n_head),
        mxu_dtype=mxu_dtype)
    return _merge_heads(ctx, B, n_head)


# --------------------------------------------------------------------------- #
# One-time parameter preparation + module forward
# --------------------------------------------------------------------------- #
def prepare_params(params, n_head, mxu_dtype=jnp.bfloat16):
    """One-time weight preparation (call once, outside the forward pass):
      * fold the 1/sqrt(d_head) softmax scale into WQ / bQ,
      * cast weights to the MXU operand dtype (bf16 by default on v5e/v6e/v7x),
      * materialize the fused (D, 3D) QKV weight / (3D,) bias once for the
        self-attention fast path.
    Biases stay f32 (added to the f32 accumulator)."""
    d_model = params["wq"].shape[0]
    d_head = d_model // n_head
    scale = 1.0 / math.sqrt(d_head)

    wq = (params["wq"] * scale).astype(mxu_dtype)
    wk = params["wk"].astype(mxu_dtype)
    wv = params["wv"].astype(mxu_dtype)
    wo = params["wo"].astype(mxu_dtype)
    bq = (params["bq"] * scale).astype(jnp.float32)
    bk = params["bk"].astype(jnp.float32)
    bv = params["bv"].astype(jnp.float32)
    bo = params["bo"].astype(jnp.float32)

    return {
        "n_head": n_head, "d_model": d_model, "d_head": d_head,
        "mxu_dtype": mxu_dtype,
        "wq": wq, "bq": bq, "wk": wk, "bk": bk, "wv": wv, "bv": bv,
        "wo": wo, "bo": bo,
        "w_qkv": jnp.concatenate([wq, wk, wv], axis=1),
        "b_qkv": jnp.concatenate([bq, bk, bv], axis=0),
    }


def multihead_attention(q, k, v, prepared):
    """Forward pass of the PyTorch MultiHeadAttention module (mask=None path).
    `prepared` must come from prepare_params().  The self-attention fast path
    triggers on object identity of q/k/v (how self-attention is normally
    called)."""
    B, L, D = q.shape
    n_head = prepared["n_head"]
    d_head = prepared["d_head"]
    mxu_dtype = prepared["mxu_dtype"]
    self_attn = (q is k) and (k is v)

    if self_attn:
        # Fused QKV projection: one tiled matmul over the cached (D, 3D)
        # weight, x is read from HBM exactly once.
        qkv = linear(q.reshape(B * L, D), prepared["w_qkv"],
                     prepared["b_qkv"]).reshape(B, L, 3 * D)
        if d_head % 128 == 0:
            # Attention reads Q/K/V straight out of the fused activation via
            # d_head-wide column-block index maps (no splits, no transposes).
            ctx = flash_attention_heads_in_grid(
                qkv, qkv, qkv, n_head=n_head, d_head=d_head, mxu_dtype=mxu_dtype,
                q_off=0, k_off=n_head, v_off=2 * n_head)
        else:
            Q = qkv[:, :, :D]
            K = qkv[:, :, D:2 * D]
            V = qkv[:, :, 2 * D:]
            ctx = _attention_small_head(Q, K, V, B, n_head, mxu_dtype)
    else:
        Bk, Lk, _ = k.shape
        Q = linear(q.reshape(B * L, D), prepared["wq"], prepared["bq"]).reshape(B, L, D)
        K = linear(k.reshape(Bk * Lk, D), prepared["wk"], prepared["bk"]).reshape(Bk, Lk, D)
        V = linear(v.reshape(Bk * Lk, D), prepared["wv"], prepared["bv"]).reshape(Bk, Lk, D)
        if d_head % 128 == 0:
            ctx = flash_attention_heads_in_grid(
                Q, K, V, n_head=n_head, d_head=d_head, mxu_dtype=mxu_dtype)
        else:
            ctx = _attention_small_head(Q, K, V, B, n_head, mxu_dtype)

    out = linear(ctx.reshape(B * L, D), prepared["wo"], prepared["bo"])
    return out.reshape(B, L, D)


# --------------------------------------------------------------------------- #
# Pure-JAX reference (exact module math, f32)
# --------------------------------------------------------------------------- #
def _reference(q, k, v, params, n_head):
    B, Lq, D = q.shape
    Lk = k.shape[1]
    d_head = D // n_head

    def split(T, L_):
        return T.reshape(B, L_, n_head, d_head).transpose(0, 2, 1, 3)

    Q = split(q @ params["wq"] + params["bq"], Lq)
    K = split(k @ params["wk"] + params["bk"], Lk)
    V = split(v @ params["wv"] + params["bv"], Lk)
    s = jnp.einsum("bhqd,bhkd->bhqk", Q, K) / math.sqrt(d_head)
    p = jax.nn.softmax(s, axis=-1)
    o = jnp.einsum("bhqk,bhkd->bhqd", p, V)
    o = o.transpose(0, 2, 1, 3).reshape(B, Lq, D)
    return o @ params["wo"] + params["bo"]


def _make_params(key, d_model):
    ks = jax.random.split(key, 8)
    bound = 1.0 / math.sqrt(d_model)
    u = lambda kk, shape: jax.random.uniform(kk, shape, jnp.float32, -bound, bound)
    return {
        "wq": u(ks[0], (d_model, d_model)), "bq": u(ks[1], (d_model,)),
        "wk": u(ks[2], (d_model, d_model)), "bk": u(ks[3], (d_model,)),
        "wv": u(ks[4], (d_model, d_model)), "bv": u(ks[5], (d_model,)),
        "wo": u(ks[6], (d_model, d_model)), "bo": u(ks[7], (d_model,)),
    }


if __name__ == "__main__":
    key = jax.random.PRNGKey(0)

    # ---- Test 1: cross-attention, small d_head (fallback path), exact f32 --
    B, L, d_model, n_head = 2, 8, 32, 4           # d_head = 8
    k0, k1, k2, k3, k4 = jax.random.split(key, 5)
    q = jax.random.normal(k0, (B, L, d_model), jnp.float32)
    k = jax.random.normal(k1, (B, L, d_model), jnp.float32)
    v = jax.random.normal(k2, (B, L, d_model), jnp.float32)
    params = _make_params(k3, d_model)

    prep_f32 = prepare_params(params, n_head, mxu_dtype=jnp.float32)
    out = jax.block_until_ready(multihead_attention(q, k, v, prep_f32))
    ref = _reference(q, k, v, params, n_head)
    assert out.shape == (B, L, d_model)
    # f32 MXU path: tolerance only covers the approximate (EUP) reciprocal.
    assert jnp.allclose(out, ref, rtol=2e-3, atol=2e-3), "cross-attn (f32) mismatch"

    # ---- Test 2: self-attention fast path (fused QKV + head-in-grid), bf16 --
    B2, L2, d2, h2 = 2, 16, 256, 2                # d_head = 128
    ka, kb, kc = jax.random.split(k4, 3)
    x = jax.random.normal(ka, (B2, L2, d2), jnp.float32)
    params2 = _make_params(kb, d2)

    prep_bf16 = prepare_params(params2, h2, mxu_dtype=jnp.bfloat16)
    out2 = jax.block_until_ready(multihead_attention(x, x, x, prep_bf16))
    ref2 = _reference(x, x, x, params2, h2)
    assert out2.shape == (B2, L2, d2)
    # bf16 MXU operands (f32 accumulation): widen tolerance accordingly.
    assert jnp.allclose(out2, ref2, rtol=5e-2, atol=5e-2), "self-attn (bf16) mismatch"

    # ---- Test 3: self-attention, small d_head (fused QKV + fallback), f32 ---
    x3 = jax.random.normal(kc, (B, L, d_model), jnp.float32)
    out3 = jax.block_until_ready(multihead_attention(x3, x3, x3, prep_f32))
    ref3 = _reference(x3, x3, x3, params, n_head)
    assert jnp.allclose(out3, ref3, rtol=2e-3, atol=2e-3), "self-attn (f32) mismatch"

    # ---- Test 4: cross-attention, head-in-grid path, Lq != Lk, bf16 ---------
    kq, kk, kv_ = jax.random.split(ka, 3)
    q4 = jax.random.normal(kq, (1, 8, d2), jnp.float32)
    k4_ = jax.random.normal(kk, (1, 16, d2), jnp.float32)
    v4 = jax.random.normal(kv_, (1, 16, d2), jnp.float32)
    out4 = jax.block_until_ready(multihead_attention(q4, k4_, v4, prep_bf16))
    ref4 = _reference(q4, k4_, v4, params2, h2)
    assert out4.shape == (1, 8, d2)
    assert jnp.allclose(out4, ref4, rtol=5e-2, atol=5e-2), "cross-attn (bf16) mismatch"

    print("KERNEL_OK")
</pallas_src>

<mosaic_0001>
module attributes {stable_mosaic.version = 11 : i64} {
  func.func @_linear_kernel(%arg0: i32, %arg1: i32, %arg2: i32, %arg3: memref<8x32xf32, #tpu.memory_space<vmem>>, %arg4: memref<32x32xf32, #tpu.memory_space<vmem>>, %arg5: memref<1x32xf32, #tpu.memory_space<vmem>>, %arg6: memref<8x32xf32, #tpu.memory_space<vmem>>, %arg7: memref<8x32xf32, #tpu.memory_space<vmem>>) attributes {dimension_semantics = [#tpu.dimension_semantics<parallel>, #tpu.dimension_semantics<parallel>, #tpu.dimension_semantics<arbitrary>], iteration_bounds = array<i64: 2, 1, 1>, scalar_prefetch = 0 : i64, scratch_operands = 1 : i64, tpu.core_type = #tpu.core_type<tc>, window_params = [{transform_indices = @transform_0, window_bounds = array<i64: 8, 32>}, {transform_indices = @transform_1, window_bounds = array<i64: 32, 32>}, {transform_indices = @transform_2, window_bounds = array<i64: 1, 32>}, {transform_indices = @transform_3, window_bounds = array<i64: 8, 32>}]} {
    %c0_i32 = arith.constant 0 : i32
    %0 = arith.cmpi eq, %arg2, %c0_i32 : i32
    %1 = arith.extui %0 : i1 to i32
    %c0_i32_0 = arith.constant 0 : i32
    %2 = arith.cmpi ne, %1, %c0_i32_0 : i32
    scf.if %2 {
      %cst_10 = arith.constant 0.000000e+00 : f32
      %12 = vector.broadcast %cst_10 : f32 to vector<8x32xf32>
      %c0_11 = arith.constant 0 : index
      %c0_12 = arith.constant 0 : index
      %13 = vector.load %arg7[%c0_11, %c0_12] : memref<8x32xf32, #tpu.memory_space<vmem>>, vector<8x32xf32>
      tpu.vector_store %arg7[%c0_11, %c0_12], %12 {strides = array<i32>} : memref<8x32xf32, #tpu.memory_space<vmem>>, vector<8x32xf32>,
    } else {
    }
    %c0 = arith.constant 0 : index
    %c0_1 = arith.constant 0 : index
    %3 = vector.load %arg7[%c0, %c0_1] : memref<8x32xf32, #tpu.memory_space<vmem>>, vector<8x32xf32>
    %c0_2 = arith.constant 0 : index
    %c0_3 = arith.constant 0 : index
    %4 = vector.load %arg3[%c0_2, %c0_3] : memref<8x32xf32, #tpu.memory_space<vmem>>, vector<8x32xf32>
    %c0_4 = arith.constant 0 : index
    %c0_5 = arith.constant 0 : index
    %5 = vector.load %arg4[%c0_4, %c0_5] : memref<32x32xf32, #tpu.memory_space<vmem>>, vector<32x32xf32>
    %cst = arith.constant dense<0.000000e+00> : vector<8x32xf32>
    %6 = tpu.matmul %4, %5, %cst {dimension_numbers = #tpu.dot_dimension_numbers<[1], [0], [0], [1], [0, 0, 1, 1], [], []>} : vector<8x32xf32>, vector<32x32xf32>, vector<8x32xf32> -> vector<8x32xf32>
    %7 = arith.addf %3, %6 : vector<8x32xf32>
    %c0_6 = arith.constant 0 : index
    %c0_7 = arith.constant 0 : index
    %8 = vector.load %arg7[%c0_6, %c0_7] : memref<8x32xf32, #tpu.memory_space<vmem>>, vector<8x32xf32>
    tpu.vector_store %arg7[%c0_6, %c0_7], %7 {strides = array<i32>} : memref<8x32xf32, #tpu.memory_space<vmem>>, vector<8x32xf32>,
    %c0_i32_8 = arith.constant 0 : i32
    %9 = arith.cmpi eq, %arg2, %c0_i32_8 : i32
    %10 = arith.extui %9 : i1 to i32
    %c0_i32_9 = arith.constant 0 : i32
    %11 = arith.cmpi ne, %10, %c0_i32_9 : i32
    scf.if %11 {
      %c0_10 = arith.constant 0 : index
      %c0_11 = arith.constant 0 : index
      %12 = vector.load %arg7[%c0_10, %c0_11] : memref<8x32xf32, #tpu.memory_space<vmem>>, vector<8x32xf32>
      %c0_12 = arith.constant 0 : index
      %c0_13 = arith.constant 0 : index
      %13 = vector.load %arg5[%c0_12, %c0_13] : memref<1x32xf32, #tpu.memory_space<vmem>>, vector<1x32xf32>
      %14 = vector.broadcast %13 : vector<1x32xf32> to vector<8x32xf32>
      %15 = arith.addf %12, %14 : vector<8x32xf32>
      %c0_14 = arith.constant 0 : index
      %c0_15 = arith.constant 0 : index
      %16 = vector.load %arg6[%c0_14, %c0_15] : memref<8x32xf32, #tpu.memory_space<vmem>>, vector<8x32xf32>
      tpu.vector_store %arg6[%c0_14, %c0_15], %15 {strides = array<i32>} : memref<8x32xf32, #tpu.memory_space<vmem>>, vector<8x32xf32>,
    } else {
    }
    return
  }
  func.func @transform_0(%arg0: i32, %arg1: i32, %arg2: i32) -> (i32, i32) {
    %c0_i32 = arith.constant 0 : i32
    return %arg0, %arg2 : i32, i32
  }
  func.func @transform_1(%arg0: i32, %arg1: i32, %arg2: i32) -> (i32, i32) {
    %c0_i32 = arith.constant 0 : i32
    return %arg2, %arg1 : i32, i32
  }
  func.func @transform_2(%arg0: i32, %arg1: i32, %arg2: i32) -> (i32, i32) {
    %c0_i32 = arith.constant 0 : i32
    %c0_i32_0 = arith.constant 0 : i32
    return %c0_i32, %arg1 : i32, i32
  }
  func.func @transform_3(%arg0: i32, %arg1: i32, %arg2: i32) -> (i32, i32) {
    %c0_i32 = arith.constant 0 : i32
    return %arg0, %arg1 : i32, i32
  }
}

</mosaic_0001>

<bundles_post_ra>
// kernel: tpu_custom_call.1
= control target key start
LH: loop header
LB: loop body
LE: loop exit
PB: predicated region body
PF: predicated region fallthrough
CT: control target
= control target key end

     0   :  { %8 = vsyncpa [#allocation4], 0  ;;  %s993_s0 = inlined_call_operand.hbm [shape: f32[16,32], index: 0, kind: input, shape index: {}]   ;;  %s994_s1 = inlined_call_operand.hbm [shape: f32[32,32], index: 1, kind: input, shape index: {}]   ;;  %s995_s2 = inlined_call_operand.vmem [shape: f32[1,32], index: 2, kind: input, shape index: {}]   ;;  %s996_s3 = inlined_call_operand.hbm [shape: f32[16,32], index: 3, kind: output, shape index: {}]  }
   0x1   :  { %10 = vsyncpa [#allocation4 + $0x1], 0 }
   0x2   :  { %11 = vsyncpa [#allocation7], 0 }
   0x3   :  { %12 = vsyncpa [#allocation5], 0 }
   0x4   :  { %14 = vsyncpa [#allocation5 + $0x1], 0  ;;  %s768_s12 = smov 0   ;;  %s770_s13 = smov 0  }
   0x5   :  { %s772_s14 = smov 0   ;;  %s774_s15 = smov 0  }
   0x6   :  { %s776_s16 = smov 0   ;;  %s778_s17 = smov 0  }
   0x7 LB: > { %s476_s18 = sadd.s32 4294967295, %s738_s17   ;;  %s477_s19 = sadd.s32 4294967294, %s738_s17   ;;  %s738_s17 = sphi %s778_s17, %s20_s17   ;;  %s734_s16 = sphi %s776_s16, %s1020_s16   ;;  %s730_s15 = sphi %s774_s15, %s1019_s15   ;;  %s726_s14 = sphi %s772_s14, %s1018_s14   ;;  %s722_s13 = sphi %s770_s13, %s1017_s13   ;;  %s718_s12 = sphi %s768_s12, %s1016_s12  }
   0x8   : > { %p61_p0 = scmp.ne.s32.totalorder %s722_s13, %s718_s12  ;;  %p802_p1 = scmp.eq.s32.totalorder %s476_s18, 0 }
   0x9   : > { %p806_p2 = scmp.eq.s32.totalorder %s476_s18, 1  ;;  %p147_p3 = scmp.eq.s32.totalorder %s477_s19, 1 }
   0xa   : > { %s1001_s20 = scalar_select %p802_p1, 1, 0 }
   0xb   : > { %s1002_s21 = scalar_select %p806_p2, 1, 0 }
   0xc   : > { %p812_p4 = por %p802_p1, %p61_p0  ;;  %p478_p5 = scmp.ge.s32.totalorder %s738_s17, 1 }
   0xd   : > { %p817_p6 = por %p147_p3, %p61_p0  ;;  %p154_p7 = scmp.lt.s32.totalorder %s738_s17, 3 }
   0xe   : > { %s1003_s22 = scalar_select %p812_p4, 1, 0 }
   0xf   : > { %s1004_s23 = scalar_select %p817_p6, 1, 0 }
  0x10   : > { %p822_p8 = pnand %p478_p5, %p154_p7  ;;  %s740_s25 = smov [#allocation6]  }
  0x11   : > { %s170_s26 = sshll.u32 %s740_s25, 4  ;;  %s39_s28 = sadd.s32 1, %s734_s16  ;;  %s171_s26 = int_to_ptr.vmem [resolvable:$true] %s170_s26 }
  0x12   : > { %s1005_s24 = scalar_select %p822_p8, 1, 0 }
  0x13   : > { %p524_p9 = pneg %p822_p8  ;;  %s594_s4 = scalar_lea.hbm %s994_s1, 512 }
  0x14   : > { %p595_p12 = scmp.ne.s32.totalorder %s994_s1, %s594_s4  ;;  %p601_p5 = scmp.lt.u32.totalorder %s594_s4, %s994_s1 }
  0x15   : > { %p831_p11 = pnand %p524_p9, %p802_p1 }
  0x17   : > { %p596_p13 = pneg %p831_p11 }
  0x19   : > { %p597_p0 = pnand %p596_p13, %p595_p12 }
  0x1b   : > { %p598_p3 = pneg %p597_p0 }
  0x1d   : > { %p603_p7 = pnand %p601_p5, %p598_p3 }
  0x1f   : > { %606 = shalt.err (!%p603_p7)
}
  0x20   : > { %s607_s9 = scalar_lea.vmem %s171_s26, 512  ;;  %p615_p1 = scmp.lt.s32.totalorder %s171_s26, %s171_s26 }
  0x21   : > { %p608_p9 = scmp.ne.s32.totalorder %s171_s26, %s607_s9  ;;  %p616_p4 = scmp.lt.s32.totalorder %s607_s9, %s607_s9 }
  0x23   : > { %p610_p10 = pnand %p608_p9, %p596_p13  ;;  %p617_p8 = por %p616_p4, %p615_p1 }
  0x25   : > { %p611_p6 = pneg %p610_p10 }
  0x27   : > { %p618_p2 = pnand %p617_p8, %p611_p6 }
  0x29   : > { %621 = shalt.err (!%p618_p2)
}
  0x2a   : > { %s741_s10 = smov 128   ;;  %s742_s11 = smov 8  }
  0x2b   : > { %527 = dma.hbm_to_vmem [thread:$0]  (!%p831_p11), %s994_s1, 512, %s171_s26, [#allocation7], %s741_s10, %s741_s10, %s742_s11  }
  0x2c   : > { %p41_p1 = scmp.ge.s32.totalorder %s39_s28, 2  ;;  %s48_s25 = sadd.s32 1, %s726_s14 }
  0x2d   : > { %p55_p2 = scmp.ne.s32.totalorder %s726_s14, %s722_s13  ;;  %p56_p4 = scmp.eq.s32.totalorder %s738_s17, 0 }
  0x2e   : > { %s1022_s28 = smov (%p41_p1, %s39_s28), 0  ;;  %p1008_p8 = scmp.ne.s32.totalorder %s1002_s21, 0 }
  0x2f   : > { %p858_p6 = por %p56_p4, %p55_p2  ;;  %s43_s27 = ssub.s32 %s734_s16, %s1022_s28 }
  0x30   : > { %p864_p10 = por %p1008_p8, %p55_p2  ;;  %p537_p12 = scmp.lt.s32.totalorder %s738_s17, 2 }
  0x31   : > { %p46_p11 = scmp.eq.s32.totalorder %s43_s27, 0  ;;  %s190_s26 = sand.u32 1, %s726_s14  }
  0x32   : > { %s482_s4 = sshll.u32 %s190_s26, 3  ;;  %s483_s6 = sshll.u32 %s734_s16, 7 }
  0x33   : > { %s873_s5 = scalar_select %p46_p11, %s726_s14, %s48_s25  }
  0x34   : > { %s879_s9 = scalar_lea.hbm %s993_s0, %s483_s6  ;;  %s194_s21 = scalar_lea.vmem [#allocation3], %s482_s4 }
  0x35   : > { %s202_s10 = sshll.u32 %s194_s21, 4  ;;  %p885_p13 = pnand %p537_p12, %p858_p6  ;;  %s881_s10 = int_to_ptr.vmem [resolvable:$true] %s202_s10 }
  0x36   : > { %s191_s18 = scalar_lea.sflag [#allocation4], %s190_s26  ;;  %s622_s19 = scalar_lea.hbm %s879_s9, 128 }
  0x37   : > { %p623_p0 = scmp.ne.s32.totalorder %s879_s9, %s622_s19  ;;  %p624_p3 = pneg %p885_p13 }
  0x38   : > { %s627_s4 = scalar_lea.hbm %s993_s0, 256  ;;  %p628_p9 = scmp.lt.u32.totalorder %s879_s9, %s993_s0 }
  0x39   : > { %p625_p5 = pnand %p624_p3, %p623_p0  ;;  %p629_p1 = scmp.lt.u32.totalorder %s627_s4, %s622_s19 }
  0x3a   : > { %p631_p4 = scmp.lt.u32.totalorder %s622_s19, %s879_s9 }
  0x3b   : > { %p626_p7 = pneg %p625_p5  ;;  %p630_p2 = por %p629_p1, %p628_p9 }
  0x3d   : > { %p632_p6 = por %p631_p4, %p630_p2 }
  0x3f   : > { %p633_p8 = pnand %p632_p6, %p626_p7 }
  0x41   : > { %636 = shalt.err (!%p633_p8)
}
  0x42   : > { %s637_s26 = scalar_lea.vmem %s881_s10, 128  ;;  %s743_s7 = smov [#allocation3]  }
  0x43   : > { %p638_p12 = scmp.ne.s32.totalorder %s881_s10, %s637_s26  ;;  %s642_s8 = sshll.u32 %s743_s7, 4  ;;  %s643_s8 = int_to_ptr.vmem [resolvable:$false] %s642_s8 }
  0x44   : > { %s644_s21 = scalar_lea.vmem %s643_s8, 256  ;;  %p645_p5 = scmp.lt.s32.totalorder %s881_s10, %s643_s8 }
  0x45   : > { %p640_p11 = pnand %p638_p12, %p624_p3  ;;  %p646_p9 = scmp.lt.s32.totalorder %s644_s21, %s637_s26 }
  0x47   : > { %p641_p0 = pneg %p640_p11  ;;  %p647_p1 = por %p646_p9, %p645_p5 }
  0x49   : > { %p648_p2 = pnand %p647_p1, %p641_p0 }
  0x4b   : > { %651 = shalt.err (!%p648_p2)
}
  0x4c   : > { %531 = dma.hbm_to_vmem [thread:$0]  (!%p885_p13), %s879_s9, 128, %s881_s10, %s191_s18  }
  0x4d   : > { %p1011_p7 = scmp.ne.s32.totalorder %s1005_s24, 0 }
  0x4e   : > { %s917_s19 = sand.u32 (!%p1011_p7), 1, %s722_s13   ;;  %p1012_p3 = scmp.ne.s32.totalorder (!%p1011_p7), %s1003_s22, 0 }
  0x4f   : > { %211 = sbr.rel (%p1011_p7) target bundleno = 339 (0x153), region = 32  ;;  %s485_s25 = sshll.u32 (!%p1011_p7), %s917_s19, 3 }
  0x50   : > { %s214_s27 = scalar_lea.sflag (!%p1011_p7), [#allocation4], %s917_s19  ;;  %s217_s4 = scalar_lea.vmem (!%p1011_p7), [#allocation3], %s485_s25 }
  0x56   : > { %705 = dma.done.wait (%p1012_p3), %s214_s27, 128  }
  0x57   : > { %707 = vsyncadd (%p1012_p3), %s214_s27, 4294967168  ;;  %p1013_p13 = scmp.ne.s32.totalorder %s1001_s20, 0 }
  0x59   : > { %709 = dma.done.wait (%p1013_p13), [#allocation7], 512  }
  0x5a   : > { %711 = vsyncadd (%p1013_p13), [#allocation7], 4294966784  ;;  %vm255_vm0 = vcmask 261120   ;;  %v744_v0 = vmov 0.0|0.0   ;;  %v745_v1 = vmov 0.0   ;;  %vm746_vm1 = vmmov 0  }
  0x5b   : > { %510 = vmatprep.subr.bf16.mxu0 %v744_v0  ;;  %256 = vst.msk [vmem:[#allocation2] sm:$0xff] %vm255_vm0, %v745_v1  ;;  %507 = vmatprep.mubr.msk.f32.mxu0 %vm746_vm1, %v745_v1  ;;  %v259_v2 = vld [vmem:[#allocation6] sm:$0xff]  ;;  %v260_v3 = vld [vmem:[#allocation6 + $0x8] sm:$0xff]  ;;  %v261_v4 = vld [vmem:[#allocation6 + $0x10] sm:$0xff]  ;;  %s491_s24 = sshll.u32 %s730_s15, 7  ;;  %s246_s9 = scalar_lea.vmem [#allocation8], %s485_s25 }
  0x5c   : > { %v511_v5 = vpack.c.bf16 %v260_v3, %v259_v2  ;;  %v262_v6 = vld [vmem:[#allocation6 + $0x18] sm:$0xff]  ;;  %v489_v13 = vld [vmem:[%s995_s2] ss:$0 sm:$0xff]  ;;  %s367_s10 = sshll.u32 %s246_s9, 4  ;;  %s943_s29 = scalar_lea.hbm %s996_s3, %s491_s24  ;;  %s945_s10 = int_to_ptr.vmem [resolvable:$true] %s367_s10 }
  0x5d   : > { %v514_v7 = vpack.c.bf16 %v262_v6, %v261_v4  ;;  %v258_v8 = vld [vmem:[%s217_s4] sm:$0xff]  ;;  %s353_s6 = scalar_lea.sflag [#allocation5], %s917_s19  ;;  %s652_s26 = scalar_lea.vmem %s945_s10, 128 }
  0x5e   : > { %512 = vmatpush3.bf16.msra.mxu0 %v511_v5  ;;  %p653_p4 = scmp.ne.s32.totalorder %s945_s10, %s652_s26  ;;  %s747_s15 = smov [#allocation8]  }
  0x5f   : > { %513 = vmatprep.subr.bf16.mxu0 %v744_v0  ;;  %s656_s7 = sshll.u32 %s747_s15, 4  ;;  %s657_s7 = int_to_ptr.vmem [resolvable:$false] %s656_s7 }
  0x60   : > { %p654_p6 = pnand %p653_p4, %p864_p10  ;;  %s658_s8 = scalar_lea.vmem %s657_s7, 256 }
  0x61   : > { %p659_p12 = scmp.lt.s32.totalorder %s945_s10, %s657_s7  ;;  %p660_p11 = scmp.lt.s32.totalorder %s658_s8, %s652_s26 }
  0x62   : > { %515 = vmatpush3.bf16.msra.mxu0 %v514_v7  ;;  %v257_v9 = vld [vmem:[#allocation2] sm:$0xff]  ;;  %p655_p8 = pneg %p654_p6 }
  0x63   : > { %p661_p0 = por %p660_p11, %p659_p12 }
  0x65   : > { %508 = vmatmul.mubr.msk.f32.vlgmr.msra.gmra.mrb[0].mxu0 %vm255_vm0, %v258_v8  ;;  %p662_p5 = pnand %p661_p0, %p655_p8 }
 0x138   : > { %v333_v10 = vpop.f32.mrb[0].mxu0 }
 0x139   : > { %v337_v11 = vadd.f32 %v333_v10, %v257_v9  ;;  %v509_v12 = vpop.f32.mrb[1].mxu0 }
 0x13b   : > { %338 = vst.msk [vmem:[#allocation2] sm:$0xff] %vm255_vm0, %v337_v11 }
 0x142   : > { %v342_v14 = vld [vmem:[#allocation2] sm:$0xff] }
 0x143   : > { %v350_v15 = vadd.f32 %v489_v13, %v342_v14 }
 0x145   : > { %351 = vst.msk [vmem:[%s246_s9] sm:$0xff] %vm255_vm0, %v350_v15 }
 0x146   : > { %665 = shalt.err (!%p662_p5)
}
 0x147   : > { %s666_s21 = scalar_lea.hbm %s943_s29, 128  ;;  %s670_s27 = scalar_lea.hbm %s996_s3, 256 }
 0x148   : > { %p667_p9 = scmp.ne.s32.totalorder %s943_s29, %s666_s21  ;;  %p671_p7 = scmp.lt.u32.totalorder %s943_s29, %s996_s3 }
 0x149   : > { %p672_p3 = scmp.lt.u32.totalorder %s670_s27, %s666_s21  ;;  %p674_p4 = scmp.lt.u32.totalorder %s666_s21, %s943_s29 }
 0x14a   : > { %p668_p1 = pnand %p667_p9, %p864_p10 }
 0x14b   : > { %p673_p13 = por %p672_p3, %p671_p7 }
 0x14c   : > { %p669_p2 = pneg %p668_p1 }
 0x14d   : > { %p675_p6 = por %p674_p4, %p673_p13 }
 0x14f   : > { %p676_p8 = pnand %p675_p6, %p669_p2 }
 0x151   : > { %679 = shalt.err (!%p676_p8)
}
 0x152   : > { %522 = dma.vmem_to_hbm [thread:$0]  (%p864_p10), %s945_s10, 128, %s943_s29, %s353_s6  }
 0x153 PF: > { %s379_s22 = sand.u32 1, %s718_s12   ;;  %p1014_p12 = scmp.ne.s32.totalorder %s1004_s23, 0 }
 0x154   : > { %p1015_p11 = scmp.ge.s32.totalorder %s738_s17, 2  ;;  %s380_s24 = scalar_lea.sflag [#allocation5], %s379_s22 }
 0x156   : > { %p533_p0 = pnand %p1015_p11, %p1014_p12 }
 0x158   : > { %713 = dma.done.wait (!%p533_p0), %s380_s24, 128  }
 0x159   : > { %715 = vsyncadd (!%p533_p0), %s380_s24, 4294967168  ;;  %s20_s17 = sadd.s32 1, %s738_s17   ;;  %s1016_s12 = smov %s722_s13 }
 0x15a   : > { %p17_p5 = scmp.ge.s32.totalorder %s20_s17, 4   ;;  %s1017_s13 = smov %s726_s14 }
 0x15b   : > { %s1018_s14 = smov %s873_s5  ;;  %s1019_s15 = smov %s734_s16 }
 0x15c   : > { %s1020_s16 = smov %s1022_s28  ;;  %19 = sbr.rel (!%p17_p5) target bundleno = 7 (0x7), region = 93 }
 0x163   :  { %385 = vsyncpa [#allocation4], 1 }
 0x164   :  { %387 = vsyncpa [#allocation4 + $0x1], 1 }
 0x165   :  { %388 = vsyncpa [#allocation7], 1 }
 0x166   :  { %389 = vsyncpa [#allocation5], 1 }
 0x167   :  { %391 = vsyncpa [#allocation5 + $0x1], 1 }

</bundles_post_ra>
